<compile_context>
chip_gen: v7x
topology: tpu7x:2x2x1
jax: 0.10.0
libtpu: 0.0.40
codegen_flags: <defaults>
</compile_context>

<pallas_src>
import math

import jax
import jax.numpy as jnp
from jax.experimental import pallas as pl
from jax.experimental.pallas import tpu as pltpu

_LANES = 128
_SUBLANES = 8
_SMALL_PAD_MAX = 1 << 16          # misaligned tensors up to this size get a tiny pad copy
_VMEM_LIMIT = 48 * 1024 * 1024


def _chip_kind():
    try:
        return jax.devices()[0].device_kind.lower()
    except Exception:  # pragma: no cover - defensive
        return ""


_KIND = _chip_kind()
_IS_V7 = ("v7" in _KIND) or ("tpu7" in _KIND)
# Chips with 2 TensorCores behind one device (megacore-style): v4, v5p, v7x.
_NUM_TC = 2 if (_IS_V7 or "v4" in _KIND or "v5p" in _KIND) else 1
_BLOCK_ROWS = 4096 if _IS_V7 else 1024    # (rows,128) f32 block: 2 MiB on v7x, 512 KiB else
# TODO(synk): pltpu.CORE_PARALLEL on the outer axis and pl.Buffered(3) on large-tensor
# in_specs are the remaining v7x levers; kept on "parallel"/default double-buffering here
# for lowering safety.


def _sq_diff(x, y):
    d = x - y
    return d * d


def _make_fused_sum_kernel(metas):
    """Kernel: for every sub-group (n_in, rows, br, nb, fn, g) accumulate
    sum(fn(*refs)) into the lane-dense (8,128) accumulator slot o_ref[0, g].

    The output block (indexed by the outer grid axis only) stays resident in VMEM
    across the inner 'arbitrary' axis and is the accumulator (VPU adds only on the
    hot path; one tiny cross-lane reduce happens outside the kernel).
    """

    def kernel(*refs):
        in_refs, o_ref = refs[:-1], refs[-1]
        i = pl.program_id(1)
        s = pl.program_id(0) * pl.num_programs(1) + i     # global block step

        @pl.when(i == 0)
        def _():
            o_ref[...] = jnp.zeros_like(o_ref)

        off = 0
        for n_in, rows, br, nb, fn, g in metas:
            grefs = in_refs[off:off + n_in]
            off += n_in

            def compute(grefs=grefs, fn=fn):
                # inputs stream in native dtype; upcast in-kernel
                return fn(*(r[...].astype(jnp.float32) for r in grefs))   # (br, 128)

            def accumulate(v, g=g, br=br):
                if br % _SUBLANES == 0:
                    # fold into the (8,128) slot with VPU adds only (free reshape)
                    o_ref[0, g] += v.reshape(br // _SUBLANES, _SUBLANES, _LANES).sum(axis=0)
                else:
                    # tiny full-array blocks: sublane (XLU) reduce, add into row 0 only
                    row = jnp.broadcast_to(v.sum(axis=0, keepdims=True),
                                           (_SUBLANES, _LANES))
                    rid = jax.lax.broadcasted_iota(jnp.int32, (_SUBLANES, _LANES), 0)
                    o_ref[0, g] += jnp.where(rid == 0, row, 0.0)

            if rows % br == 0:
                @pl.when(s < nb)                           # skip finished tensors
                def _(compute=compute, accumulate=accumulate):
                    accumulate(compute())
            else:
                # Unmasked fast path for full blocks; the iota row-mask only runs on
                # the ragged trailing block (keeps the hot path off the VALU slot).
                @pl.when(s < nb - 1)
                def _(compute=compute, accumulate=accumulate):
                    accumulate(compute())

                @pl.when(s == nb - 1)
                def _(compute=compute, accumulate=accumulate, rows=rows, br=br, nb=nb):
                    v = compute()
                    rid = jax.lax.broadcasted_iota(jnp.int32, (br, _LANES), 0)
                    accumulate(jnp.where(rid < rows - (nb - 1) * br, v, 0.0))

    return kernel


def _fused_blockwise_sums(group_terms):
    """group_terms: list (length n_groups) of lists of terms (arrays, fn, pad_value).

    Returns an f32 vector of length n_groups where entry g is
        sum over terms t of group g of sum(fn_t(*arrays_t)),
    computed inside ONE fused pallas_call whenever possible.
    """
    n_groups = len(group_terms)
    slabs, metas = [], []
    extras = [jnp.zeros((), jnp.float32)] * n_groups

    for g, terms in enumerate(group_terms):
        for arrays, fn, pad_value in terms:
            n = int(arrays[0].size)
            if any(int(a.size) != n for a in arrays):
                raise ValueError("all arrays of a term must have the same element count")
            if n == 0:
                continue
            if n % _LANES == 0:
                # free reshape, zero extra HBM traffic
                rows = n // _LANES
                term_slabs = [a.reshape(rows, _LANES) for a in arrays]
            elif n <= _SMALL_PAD_MAX:
                # small misaligned tensor: append a <128-element neutral tail (tiny copy)
                rows = pl.cdiv(n, _LANES)
                pad = rows * _LANES - n
                term_slabs = [
                    jnp.concatenate(
                        [a.reshape(-1),
                         jnp.full((pad,), pad_value, dtype=a.dtype)]).reshape(rows, _LANES)
                    for a in arrays]
            else:
                # TODO(synk): large tensors whose size is not a multiple of 128 take a
                # single fused XLA pass (read-once; avoids the whole-array padding copy)
                # instead of the Pallas stream.
                extras[g] = extras[g] + jnp.sum(
                    fn(*(a.astype(jnp.float32) for a in arrays)))
                continue
            br = min(_BLOCK_ROWS, rows)
            nb = pl.cdiv(rows, br)
            metas.append((len(arrays), rows, br, nb, fn, g))
            slabs.extend(term_slabs)

    extras_vec = jnp.stack(extras)
    if not metas:
        return extras_vec

    max_nb = max(m[3] for m in metas)
    n_outer = min(_NUM_TC, max_nb)
    inner = pl.cdiv(max_nb, n_outer)

    in_specs = []
    for n_in, _rows, br, nb, _fn, _g in metas:
        # clamp the block index so finished tensors pin their last block (no re-DMA);
        # the pl.when guard in the kernel skips their compute.
        spec = pl.BlockSpec(
            (br, _LANES),
            lambda o, i, nb=nb, inner=inner: (jnp.minimum(o * inner + i, nb - 1), 0))
        in_specs.extend([spec] * n_in)

    partials = pl.pallas_call(
        _make_fused_sum_kernel(tuple(metas)),
        out_shape=jax.ShapeDtypeStruct((n_outer, n_groups, _SUBLANES, _LANES),
                                       jnp.float32),
        grid_spec=pltpu.PrefetchScalarGridSpec(
            num_scalar_prefetch=0,
            grid=(n_outer, inner),
            in_specs=in_specs,
            out_specs=pl.BlockSpec((1, n_groups, _SUBLANES, _LANES),
                                   lambda o, i: (o, 0, 0, 0)),
        ),
        compiler_params=pltpu.CompilerParams(
            dimension_semantics=("parallel", "arbitrary"),
            vmem_limit_bytes=_VMEM_LIMIT),
    )(*slabs)

    # tiny lane-dense partials -> per-group scalars; fuses with the scalar epilogue
    return extras_vec + jnp.sum(partials, axis=(0, 2, 3))


@jax.jit
def pallas_sum_log(tensors):
    """sum_k sum(log(tensors[k])) — all tensors fused into one pallas_call."""
    return _fused_blockwise_sums([[((t,), jnp.log, 1.0) for t in tensors]])[0]


@jax.jit
def pallas_sum_sq_diff(a, b):
    """sum((a - b)^2) over every element."""
    return _fused_blockwise_sums([[((a, b), _sq_diff, 0.0)]])[0]


# ---------------------------------------------------------------------------
# RateDistortionLoss forward (metric='mse', return_type='all')
# ---------------------------------------------------------------------------
@jax.jit
def rate_distortion_loss(output, target, lmbda=0.01):
    # TODO(synk): metric='ms-ssim' path (multi-scale SSIM) not implemented; only 'mse'.
    N, _, H, W = target.shape
    # NOTE: channels are deliberately excluded (CompressAI bpp definition).
    num_pixels = N * H * W

    x_hat = output["x_hat"]
    liks = list(output["likelihoods"].values())

    # ONE fused pallas_call:
    #   group 0 -> sum((x_hat - target)^2)
    #   group 1 -> sum_k sum(log(likelihoods_k))
    sums = _fused_blockwise_sums([
        [((x_hat, target), _sq_diff, 0.0)],
        [((l,), jnp.log, 1.0) for l in liks],
    ])

    out = {}
    # bpp_loss = sum_k log(likelihoods_k).sum() / (-log(2) * num_pixels)
    out["bpp_loss"] = sums[1] / (-math.log(2) * num_pixels)
    # mse_loss = mean((x_hat - target)^2)   (nn.MSELoss default reduction='mean')
    mse = sums[0] / x_hat.size
    out["mse_loss"] = mse
    distortion = (255.0 ** 2) * mse
    out["loss"] = lmbda * distortion + out["bpp_loss"]
    out["psnr"] = 10.0 * jnp.log10(1.0 / mse)
    out["y_norm1"] = output["y_norm1"]
    out["q_norm"] = output["q_norm"]
    return out


# ---------------------------------------------------------------------------
# Main
# ---------------------------------------------------------------------------
if __name__ == "__main__":
    key = jax.random.PRNGKey(0)
    keys = jax.random.split(key, 9)

    # Small shapes consistent with the module's forward (NCHW target).
    N, C, H, W = 2, 4, 16, 16
    target = jax.random.uniform(keys[0], (N, C, H, W), dtype=jnp.float32)
    x_hat = jax.random.uniform(keys[1], (N, C, H, W), dtype=jnp.float32)

    # Typical compressai "likelihoods" dict: strictly-positive probabilities.
    likelihoods = {
        "y": jax.random.uniform(keys[2], (N, 8, 4, 4), dtype=jnp.float32,
                                minval=1e-3, maxval=1.0),
        "z": jax.random.uniform(keys[3], (N, 8, 1, 1), dtype=jnp.float32,
                                minval=1e-3, maxval=1.0),
    }

    output = {
        "x_hat": x_hat,
        "likelihoods": likelihoods,
        "y_norm1": jax.random.uniform(keys[4], (), dtype=jnp.float32),
        "q_norm": jax.random.uniform(keys[5], (), dtype=jnp.float32),
    }

    result = rate_distortion_loss(output, target, lmbda=0.01)
    result = jax.tree_util.tree_map(jax.block_until_ready, result)

    # Pure-JAX reference check.
    ref_bpp = sum(jnp.sum(jnp.log(l)) for l in likelihoods.values()) / (
        -math.log(2) * (N * H * W))
    ref_mse = jnp.mean((x_hat - target) ** 2)
    ref_loss = 0.01 * (255.0 ** 2) * ref_mse + ref_bpp
    assert jnp.allclose(result["bpp_loss"], ref_bpp, rtol=1e-5, atol=1e-6)
    assert jnp.allclose(result["mse_loss"], ref_mse, rtol=1e-5, atol=1e-7)
    assert jnp.allclose(result["loss"], ref_loss, rtol=1e-5, atol=1e-6)

    # Extra checks: multi-block grids + gated ragged-trailing-block mask + fused groups.
    big_a = jax.random.uniform(keys[6], (1, 3, 224, 224), dtype=jnp.float32)
    big_b = jax.random.uniform(keys[7], (1, 3, 224, 224), dtype=jnp.float32)
    got_sq = pallas_sum_sq_diff(big_a, big_b)
    ref_sq = jnp.sum((big_a - big_b) ** 2)
    assert jnp.allclose(got_sq, ref_sq, rtol=1e-4, atol=1e-2), (got_sq, ref_sq)

    big_l = jax.random.uniform(keys[8], (1, 192, 28, 28), dtype=jnp.float32,
                               minval=1e-3, maxval=1.0)
    got_lg = pallas_sum_log([big_l, likelihoods["z"]])
    ref_lg = jnp.sum(jnp.log(big_l)) + jnp.sum(jnp.log(likelihoods["z"]))
    assert jnp.allclose(got_lg, ref_lg, rtol=2e-4, atol=1.0), (got_lg, ref_lg)

    print("KERNEL_OK")
</pallas_src>

<mosaic_0001>
module attributes {stable_mosaic.version = 11 : i64} {
  func.func @kernel(%arg0: i32, %arg1: i32, %arg2: memref<16x128xf32, #tpu.memory_space<vmem>>, %arg3: memref<16x128xf32, #tpu.memory_space<vmem>>, %arg4: memref<2x128xf32, #tpu.memory_space<vmem>>, %arg5: memref<1x128xf32, #tpu.memory_space<vmem>>, %arg6: memref<1x2x8x128xf32, #tpu.memory_space<vmem>>) attributes {dimension_semantics = [#tpu.dimension_semantics<parallel>, #tpu.dimension_semantics<arbitrary>], iteration_bounds = array<i64: 1, 1>, scalar_prefetch = 0 : i64, scratch_operands = 0 : i64, tpu.core_type = #tpu.core_type<tc>, window_params = [{transform_indices = @transform_0, window_bounds = array<i64: 16, 128>}, {transform_indices = @transform_1, window_bounds = array<i64: 16, 128>}, {transform_indices = @transform_2, window_bounds = array<i64: 2, 128>}, {transform_indices = @transform_3, window_bounds = array<i64: 1, 128>}, {transform_indices = @transform_4, window_bounds = array<i64: 1, 2, 8, 128>}]} {
    %c1_i32 = arith.constant 1 : i32
    %0 = arith.muli %arg0, %c1_i32 : i32
    %1 = arith.addi %0, %arg1 : i32
    %c0_i32 = arith.constant 0 : i32
    %2 = arith.cmpi eq, %arg1, %c0_i32 : i32
    %3 = arith.extui %2 : i1 to i32
    %c0_i32_0 = arith.constant 0 : i32
    %4 = arith.cmpi ne, %3, %c0_i32_0 : i32
    scf.if %4 {
      %cst = arith.constant 0.000000e+00 : f32
      %14 = vector.broadcast %cst : f32 to vector<1x2x8x128xf32>
      %c0 = arith.constant 0 : index
      %c0_7 = arith.constant 0 : index
      %c0_8 = arith.constant 0 : index
      %c0_9 = arith.constant 0 : index
      %15 = vector.load %arg6[%c0, %c0_7, %c0_8, %c0_9] : memref<1x2x8x128xf32, #tpu.memory_space<vmem>>, vector<1x2x8x128xf32>
      tpu.vector_store %arg6[%c0, %c0_7, %c0_8, %c0_9], %14 {strides = array<i32>} : memref<1x2x8x128xf32, #tpu.memory_space<vmem>>, vector<1x2x8x128xf32>,
    } else {
    }
    %c1_i32_1 = arith.constant 1 : i32
    %5 = arith.cmpi slt, %1, %c1_i32_1 : i32
    %6 = arith.extui %5 : i1 to i32
    %c0_i32_2 = arith.constant 0 : i32
    %7 = arith.cmpi ne, %6, %c0_i32_2 : i32
    scf.if %7 {
      %c0 = arith.constant 0 : index
      %c0_7 = arith.constant 0 : index
      %14 = vector.load %arg2[%c0, %c0_7] : memref<16x128xf32, #tpu.memory_space<vmem>>, vector<16x128xf32>
      %c0_8 = arith.constant 0 : index
      %c0_9 = arith.constant 0 : index
      %15 = vector.load %arg3[%c0_8, %c0_9] : memref<16x128xf32, #tpu.memory_space<vmem>>, vector<16x128xf32>
      %16 = arith.subf %14, %15 : vector<16x128xf32>
      %17 = arith.mulf %16, %16 : vector<16x128xf32>
      %c0_10 = arith.constant 0 : index
      %c0_11 = arith.constant 0 : index
      %c0_12 = arith.constant 0 : index
      %c0_13 = arith.constant 0 : index
      %18 = vector.load %arg6[%c0_10, %c0_11, %c0_12, %c0_13] : memref<1x2x8x128xf32, #tpu.memory_space<vmem>>, vector<1x1x8x128xf32>
      %19 = vector.shape_cast %18 : vector<1x1x8x128xf32> to vector<8x128xf32>
      %20 = vector.shape_cast %17 : vector<16x128xf32> to vector<2x8x128xf32>
      %cst = arith.constant dense<0.000000e+00> : vector<8x128xf32>
      %21 = vector.multi_reduction <add>, %20, %cst [0] : vector<2x8x128xf32> to vector<8x128xf32>
      %22 = arith.addf %19, %21 : vector<8x128xf32>
      %c0_14 = arith.constant 0 : index
      %c0_15 = arith.constant 0 : index
      %c0_16 = arith.constant 0 : index
      %c0_17 = arith.constant 0 : index
      %23 = vector.load %arg6[%c0_14, %c0_15, %c0_16, %c0_17] : memref<1x2x8x128xf32, #tpu.memory_space<vmem>>, vector<1x1x8x128xf32>
      %24 = vector.shape_cast %23 : vector<1x1x8x128xf32> to vector<8x128xf32>
      %25 = vector.shape_cast %22 : vector<8x128xf32> to vector<1x1x8x128xf32>
      tpu.vector_store %arg6[%c0_14, %c0_15, %c0_16, %c0_17], %25 {strides = array<i32>} : memref<1x2x8x128xf32, #tpu.memory_space<vmem>>, vector<1x1x8x128xf32>,
    } else {
    }
    %c1_i32_3 = arith.constant 1 : i32
    %8 = arith.cmpi slt, %1, %c1_i32_3 : i32
    %9 = arith.extui %8 : i1 to i32
    %c0_i32_4 = arith.constant 0 : i32
    %10 = arith.cmpi ne, %9, %c0_i32_4 : i32
    scf.if %10 {
      %c0 = arith.constant 0 : index
      %c0_7 = arith.constant 0 : index
      %14 = vector.load %arg4[%c0, %c0_7] : memref<2x128xf32, #tpu.memory_space<vmem>>, vector<2x128xf32>
      %15 = math.log %14 : vector<2x128xf32>
      %cst = arith.constant dense<0.000000e+00> : vector<128xf32>
      %16 = vector.multi_reduction <add>, %15, %cst [0] : vector<2x128xf32> to vector<128xf32>
      %17 = vector.shape_cast %16 : vector<128xf32> to vector<1x128xf32>
      %18 = vector.shape_cast %17 : vector<1x128xf32> to vector<1x128xf32>
      %19 = vector.broadcast %18 : vector<1x128xf32> to vector<8x128xf32>
      %20 = tpu.iota {dimensions = array<i32: 0>} : vector<8x128xi32>
      %c0_8 = arith.constant 0 : index
      %c1 = arith.constant 1 : index
      %c0_9 = arith.constant 0 : index
      %c0_10 = arith.constant 0 : index
      %21 = vector.load %arg6[%c0_8, %c1, %c0_9, %c0_10] : memref<1x2x8x128xf32, #tpu.memory_space<vmem>>, vector<1x1x8x128xf32>
      %22 = vector.shape_cast %21 : vector<1x1x8x128xf32> to vector<8x128xf32>
      %c0_i32_11 = arith.constant 0 : i32
      %23 = vector.broadcast %c0_i32_11 : i32 to vector<8x128xi32>
      %24 = arith.cmpi eq, %20, %23 : vector<8x128xi32>
      %cst_12 = arith.constant 0.000000e+00 : f32
      %25 = vector.broadcast %cst_12 : f32 to vector<8x128xf32>
      %26 = arith.select %24, %19, %25 : vector<8x128xi1>, vector<8x128xf32>
      %27 = arith.addf %22, %26 : vector<8x128xf32>
      %c0_13 = arith.constant 0 : index
      %c1_14 = arith.constant 1 : index
      %c0_15 = arith.constant 0 : index
      %c0_16 = arith.constant 0 : index
      %28 = vector.load %arg6[%c0_13, %c1_14, %c0_15, %c0_16] : memref<1x2x8x128xf32, #tpu.memory_space<vmem>>, vector<1x1x8x128xf32>
      %29 = vector.shape_cast %28 : vector<1x1x8x128xf32> to vector<8x128xf32>
      %30 = vector.shape_cast %27 : vector<8x128xf32> to vector<1x1x8x128xf32>
      tpu.vector_store %arg6[%c0_13, %c1_14, %c0_15, %c0_16], %30 {strides = array<i32>} : memref<1x2x8x128xf32, #tpu.memory_space<vmem>>, vector<1x1x8x128xf32>,
    } else {
    }
    %c1_i32_5 = arith.constant 1 : i32
    %11 = arith.cmpi slt, %1, %c1_i32_5 : i32
    %12 = arith.extui %11 : i1 to i32
    %c0_i32_6 = arith.constant 0 : i32
    %13 = arith.cmpi ne, %12, %c0_i32_6 : i32
    scf.if %13 {
      %c0 = arith.constant 0 : index
      %c0_7 = arith.constant 0 : index
      %14 = vector.load %arg5[%c0, %c0_7] : memref<1x128xf32, #tpu.memory_space<vmem>>, vector<1x128xf32>
      %15 = math.log %14 : vector<1x128xf32>
      %cst = arith.constant dense<0.000000e+00> : vector<128xf32>
      %16 = vector.multi_reduction <add>, %15, %cst [0] : vector<1x128xf32> to vector<128xf32>
      %17 = vector.shape_cast %16 : vector<128xf32> to vector<1x128xf32>
      %18 = vector.shape_cast %17 : vector<1x128xf32> to vector<1x128xf32>
      %19 = vector.broadcast %18 : vector<1x128xf32> to vector<8x128xf32>
      %20 = tpu.iota {dimensions = array<i32: 0>} : vector<8x128xi32>
      %c0_8 = arith.constant 0 : index
      %c1 = arith.constant 1 : index
      %c0_9 = arith.constant 0 : index
      %c0_10 = arith.constant 0 : index
      %21 = vector.load %arg6[%c0_8, %c1, %c0_9, %c0_10] : memref<1x2x8x128xf32, #tpu.memory_space<vmem>>, vector<1x1x8x128xf32>
      %22 = vector.shape_cast %21 : vector<1x1x8x128xf32> to vector<8x128xf32>
      %c0_i32_11 = arith.constant 0 : i32
      %23 = vector.broadcast %c0_i32_11 : i32 to vector<8x128xi32>
      %24 = arith.cmpi eq, %20, %23 : vector<8x128xi32>
      %cst_12 = arith.constant 0.000000e+00 : f32
      %25 = vector.broadcast %cst_12 : f32 to vector<8x128xf32>
      %26 = arith.select %24, %19, %25 : vector<8x128xi1>, vector<8x128xf32>
      %27 = arith.addf %22, %26 : vector<8x128xf32>
      %c0_13 = arith.constant 0 : index
      %c1_14 = arith.constant 1 : index
      %c0_15 = arith.constant 0 : index
      %c0_16 = arith.constant 0 : index
      %28 = vector.load %arg6[%c0_13, %c1_14, %c0_15, %c0_16] : memref<1x2x8x128xf32, #tpu.memory_space<vmem>>, vector<1x1x8x128xf32>
      %29 = vector.shape_cast %28 : vector<1x1x8x128xf32> to vector<8x128xf32>
      %30 = vector.shape_cast %27 : vector<8x128xf32> to vector<1x1x8x128xf32>
      tpu.vector_store %arg6[%c0_13, %c1_14, %c0_15, %c0_16], %30 {strides = array<i32>} : memref<1x2x8x128xf32, #tpu.memory_space<vmem>>, vector<1x1x8x128xf32>,
    } else {
    }
    return
  }
  func.func @transform_0(%arg0: i32, %arg1: i32) -> (i32, i32) {
    %c1_i32 = arith.constant 1 : i32
    %0 = arith.muli %arg0, %c1_i32 : i32
    %1 = arith.addi %0, %arg1 : i32
    %c0_i32 = arith.constant 0 : i32
    %2 = arith.minsi %1, %c0_i32 : i32
    %c0_i32_0 = arith.constant 0 : i32
    %c0_i32_1 = arith.constant 0 : i32
    return %2, %c0_i32_0 : i32, i32
  }
  func.func @transform_1(%arg0: i32, %arg1: i32) -> (i32, i32) {
    %c1_i32 = arith.constant 1 : i32
    %0 = arith.muli %arg0, %c1_i32 : i32
    %1 = arith.addi %0, %arg1 : i32
    %c0_i32 = arith.constant 0 : i32
    %2 = arith.minsi %1, %c0_i32 : i32
    %c0_i32_0 = arith.constant 0 : i32
    %c0_i32_1 = arith.constant 0 : i32
    return %2, %c0_i32_0 : i32, i32
  }
  func.func @transform_2(%arg0: i32, %arg1: i32) -> (i32, i32) {
    %c1_i32 = arith.constant 1 : i32
    %0 = arith.muli %arg0, %c1_i32 : i32
    %1 = arith.addi %0, %arg1 : i32
    %c0_i32 = arith.constant 0 : i32
    %2 = arith.minsi %1, %c0_i32 : i32
    %c0_i32_0 = arith.constant 0 : i32
    %c0_i32_1 = arith.constant 0 : i32
    return %2, %c0_i32_0 : i32, i32
  }
  func.func @transform_3(%arg0: i32, %arg1: i32) -> (i32, i32) {
    %c1_i32 = arith.constant 1 : i32
    %0 = arith.muli %arg0, %c1_i32 : i32
    %1 = arith.addi %0, %arg1 : i32
    %c0_i32 = arith.constant 0 : i32
    %2 = arith.minsi %1, %c0_i32 : i32
    %c0_i32_0 = arith.constant 0 : i32
    %c0_i32_1 = arith.constant 0 : i32
    return %2, %c0_i32_0 : i32, i32
  }
  func.func @transform_4(%arg0: i32, %arg1: i32) -> (i32, i32, i32, i32) {
    %c0_i32 = arith.constant 0 : i32
    %c0_i32_0 = arith.constant 0 : i32
    %c0_i32_1 = arith.constant 0 : i32
    %c0_i32_2 = arith.constant 0 : i32
    return %arg0, %c0_i32, %c0_i32_0, %c0_i32_1 : i32, i32, i32, i32
  }
}

</mosaic_0001>

<bundles_post_ra>
// kernel: rate_distortion_loss.1
= control target key start
LH: loop header
LB: loop body
LE: loop exit
PB: predicated region body
PF: predicated region fallthrough
CT: control target
= control target key end

     0   :  { %vm158_vm0 = vcmask 1041408   ;;  %v166_v12 = vlaneseq  ;;  %s271_s2 = inlined_call_operand.vmem [shape: f32[2,128], index: 2, kind: input, shape index: {}]   ;;  %s272_s0 = inlined_call_operand.vmem [shape: f32[16,128], index: 0, kind: input, shape index: {}]   ;;  %s273_s1 = inlined_call_operand.vmem [shape: f32[16,128], index: 1, kind: input, shape index: {}]   ;;  %s274_s3 = inlined_call_operand.vmem [shape: f32[1,128], index: 3, kind: input, shape index: {}]   ;;  %s275_s4 = inlined_call_operand.vmem [shape: f32[1,2,8,128], index: 4, kind: output, shape index: {}]  }
   0x1   :  { %v155_v0 = vld [vmem:[%s271_s2] sm:$0x3]  ;;  %v144_v2 = vld [vmem:[%s272_s0 + $0x8] sm:$0xff] }
   0x2   :  { %v143_v1 = vld [vmem:[%s272_s0] sm:$0xff]  ;;  %218 = vlog2.f32 %v155_v0  ;;  %v146_v4 = vld [vmem:[%s273_s1 + $0x8] sm:$0xff]  ;;  %v167_v16 = vshrl.u32 %v166_v12, 7 }
   0x3   :  { %v145_v3 = vld [vmem:[%s273_s1] sm:$0xff]  ;;  %v148_v6 = vsub.f32 %v144_v2, %v146_v4 }
   0x4   :  { %v147_v5 = vsub.f32 %v143_v1, %v145_v3  ;;  %v174_v7 = vld [vmem:[%s274_s3] sm:$0x1]  ;;  %v181_v21 = vsub.s32 0, %v167_v16  ;;  %vm170_vm1 = vcmp.eq.s32.totalorder %v167_v16, 0 }
   0x5   :  { %v150_v9 = vmul.f32 %v148_v6, %v148_v6  ;;  %220 = vlog2.f32 %v174_v7 }
   0x6   :  { %v149_v8 = vmul.f32 %v147_v5, %v147_v5 }
   0x8   :  { %v152_v10 = vadd.f32 %v150_v9, %v149_v8 }
   0xa   :  { %154 = vst [vmem:[%s275_s4] sm:$0xff] %v152_v10 }
   0xc   :  { %v219_v11 = vpop.eup %218 }
   0xd   :  { %v157_v13 = vmul.f32 0.6931472, %v219_v11 }
   0xf   :  { %v159_v14 = vsel %vm158_vm0, %v157_v13, 0.0  ;;  %v221_v17 = vpop.eup %220 }
  0x10   :  { %v160_v15 = vrot.slane %v159_v14, 4  ;;  %v176_v20 = vmul.f32 0.6931472, %v221_v17 }
  0x12   :  { %v161_v18 = vadd.f32 %v160_v15, %v159_v14  ;;  %v182_v24 = vrot.slane %v176_v20, %v181_v21 }
  0x14   :  { %v162_v19 = vrot.slane %v161_v18, 2  ;;  %v185_v27 = vsel %vm170_vm1, %v182_v24, 0.0 }
  0x16   :  { %v163_v22 = vadd.f32 %v162_v19, %v161_v18 }
  0x18   :  { %v164_v23 = vrot.slane %v163_v22, 1 }
  0x1a   :  { %v165_v25 = vadd.f32 %v164_v23, %v163_v22 }
  0x1c   :  { %v171_v26 = vsel %vm170_vm1, %v165_v25, 0.0 }
  0x1d   :  { %v186_v28 = vadd.f32 %v185_v27, %v171_v26 }
  0x1f   :  { %216 = vst [vmem:[%s275_s4 + $0x8] sm:$0xff] %v186_v28 }

</bundles_post_ra>
